<compile_context>
chip_gen: v7x
topology: tpu7x:2x2x1
jax: 0.10.0
libtpu: 0.0.40
codegen_flags: <defaults>
</compile_context>

<pallas_src>
import jax
import jax.numpy as jnp
from jax.experimental import pallas as pl
from jax.experimental.pallas import tpu as pltpu


def _self_attention_kernel(x_ref, wqkv_ref, bqkv_ref, o_ref):
    # x_ref:    (Bb, S, H)   input block
    # wqkv_ref: (H, 3P)      fused, pre-transposed, lane-padded [Wq^T|Wk^T|Wv^T]
    # bqkv_ref: (1, 3P)      fused, lane-padded biases (f32)
    # o_ref:    (Bb, S, H)   unpadded output (masked store at H<128 is negligible here)
    bb, s, h = x_ref.shape
    p = wqkv_ref.shape[-1] // 3
    cdt = wqkv_ref.dtype                      # MXU operand dtype (bf16 or f32)

    # Fused QKV projection: one MXU push for the whole block, f32 accumulation,
    # single f32 bias broadcast/add.
    x2d = x_ref[...].reshape(bb * s, h).astype(cdt)            # (Bb*S, H)
    qkv = jnp.dot(x2d, wqkv_ref[...],
                  preferred_element_type=jnp.float32) + bqkv_ref[...]  # (Bb*S, 3P) f32
    qkv = qkv.reshape(bb, s, 3 * p)

    # 128-lane-aligned splits; padded columns are exactly zero, so they add
    # nothing to the contractions below.
    q = qkv[:, :, 0:p]
    k = qkv[:, :, p:2 * p]
    v = qkv[:, :, 2 * p:3 * p]

    # scores = Q K^T (contract last dims; batched over Bb), f32 accumulation.
    scores = jnp.einsum('bsd,btd->bst', q.astype(cdt), k.astype(cdt),
                        preferred_element_type=jnp.float32)    # (Bb, S, S)

    # Numerically stable, exactly-normalized softmax (matches nn.Softmax(-1)).
    m = jnp.max(scores, axis=-1, keepdims=True)
    e = jnp.exp(scores - m)
    attn = e / jnp.sum(e, axis=-1, keepdims=True)              # rows sum to 1

    # context = attn @ V -> (Bb, S, P); drop the zero lane padding at the store.
    ctx = jnp.einsum('bst,btd->bsd', attn.astype(cdt), v.astype(cdt),
                     preferred_element_type=jnp.float32)       # (Bb, S, P)
    o_ref[...] = ctx[:, :, :h].astype(o_ref.dtype)


def _device_kind():
    try:
        return jax.devices()[0].device_kind.lower()
    except Exception:
        return ""


def _default_compute_dtype():
    """bf16 MXU operands on bf16-native chips (v6e / v7x); f32 otherwise."""
    kind = _device_kind()
    if ("v6" in kind) or ("v7" in kind) or ("trillium" in kind):
        return jnp.bfloat16
    return jnp.float32


def _default_num_batch_blocks(batch, seq):
    """Only split the batch across the two v7x TensorCores when each core gets
    a meaningful amount of work (>= ~256 query rows); otherwise one grid step
    (per-step overhead + duplicated weight DMA dominates at tiny shapes)."""
    kind = _device_kind()
    two_tensorcores = "v7" in kind
    if two_tensorcores and batch % 2 == 0 and (batch // 2) * seq >= 256:
        return 2
    return 1


def self_attention_pallas(lstm_out, wq, bq, wk, bk, wv, bv,
                          *, compute_dtype=None, num_batch_blocks=None):
    """lstm_out: (B, S, H) float32. wq/wk/wv: (H, H) in PyTorch (out, in) layout.
    bq/bk/bv: (H,)."""
    B, S, H = lstm_out.shape
    P = ((H + 127) // 128) * 128          # lane-padded head width (>= 128)

    if compute_dtype is None:
        compute_dtype = _default_compute_dtype()
    if num_batch_blocks is None:
        num_batch_blocks = _default_num_batch_blocks(B, S)
    assert B % num_batch_blocks == 0, "num_batch_blocks must divide the batch"
    Bb = B // num_batch_blocks

    # Wrapper-side (free, outside the kernel): pre-transpose to (in, out),
    # zero-pad each head block to P lanes, fuse into one (H, 3P) weight.
    def _pad(w_t, b_vec):
        return (jnp.pad(w_t, ((0, 0), (0, P - H))),
                jnp.pad(b_vec, ((0, P - H),)))

    wq_t, bq_p = _pad(wq.T, bq)
    wk_t, bk_p = _pad(wk.T, bk)
    wv_t, bv_p = _pad(wv.T, bv)
    wqkv = jnp.concatenate([wq_t, wk_t, wv_t], axis=1).astype(compute_dtype)
    bqkv = jnp.concatenate([bq_p, bk_p, bv_p]).reshape(1, 3 * P).astype(jnp.float32)

    return pl.pallas_call(
        _self_attention_kernel,
        out_shape=jax.ShapeDtypeStruct((B, S, H), lstm_out.dtype),
        grid_spec=pltpu.PrefetchScalarGridSpec(
            num_scalar_prefetch=0,
            grid=(num_batch_blocks,),
            in_specs=[
                pl.BlockSpec((Bb, S, H), lambda i: (i, 0, 0)),     # x
                pl.BlockSpec((H, 3 * P), lambda i: (0, 0)),        # fused W (VMEM-resident)
                pl.BlockSpec((1, 3 * P), lambda i: (0, 0)),        # fused bias
            ],
            out_specs=pl.BlockSpec((Bb, S, H), lambda i: (i, 0, 0)),
        ),
        compiler_params=pltpu.CompilerParams(
            dimension_semantics=("parallel",)),
    )(lstm_out, wqkv, bqkv)
    # TODO(synk): if S ever grows past ~1-2k, add a KV-tile grid axis with a
    # flash-style accumulator (v7x's 64 MiB VMEM halves the safe (S,S) tile).


def _reference(lstm_out, wq, bq, wk, bk, wv, bv):
    q = lstm_out @ wq.T + bq
    k = lstm_out @ wk.T + bk
    v = lstm_out @ wv.T + bv
    scores = jnp.einsum("bsd,btd->bst", q, k)      # unscaled, like the module
    w = jax.nn.softmax(scores, axis=-1)
    return jnp.einsum("bst,btd->bsd", w, v)


if __name__ == "__main__":
    # hidden_size=16, bidirectional=True -> H = 32
    B, S, H = 2, 8, 32
    key = jax.random.PRNGKey(0)
    ks = jax.random.split(key, 7)

    lstm_out = jax.random.normal(ks[0], (B, S, H), dtype=jnp.float32)

    # deterministic synthetic parameters (PyTorch Linear layout: (out, in))
    scale = 1.0 / jnp.sqrt(jnp.float32(H))
    wq = jax.random.normal(ks[1], (H, H), dtype=jnp.float32) * scale
    bq = jax.random.normal(ks[2], (H,), dtype=jnp.float32) * 0.1
    wk = jax.random.normal(ks[3], (H, H), dtype=jnp.float32) * scale
    bk = jax.random.normal(ks[4], (H,), dtype=jnp.float32) * 0.1
    wv = jax.random.normal(ks[5], (H, H), dtype=jnp.float32) * scale
    bv = jax.random.normal(ks[6], (H,), dtype=jnp.float32) * 0.1

    ref = _reference(lstm_out, wq, bq, wk, bk, wv, bv)

    # 1) f32 MXU path — tight numerical check against the reference.
    out_f32 = self_attention_pallas(lstm_out, wq, bq, wk, bk, wv, bv,
                                    compute_dtype=jnp.float32)
    out_f32 = jax.block_until_ready(out_f32)
    assert out_f32.shape == (B, S, H)
    assert jnp.allclose(out_f32, ref, atol=1e-3, rtol=1e-3)

    # 2) Default path (bf16 MXU operands on v6e/v7x, f32 elsewhere) — looser
    #    tolerance accounts for bf16 operand rounding; accumulation stays f32.
    out_def = self_attention_pallas(lstm_out, wq, bq, wk, bk, wv, bv)
    out_def = jax.block_until_ready(out_def)
    assert out_def.shape == (B, S, H)
    tol = 5e-2 if _default_compute_dtype() == jnp.bfloat16 else 1e-3
    assert jnp.allclose(out_def, ref, atol=tol, rtol=tol)

    print("KERNEL_OK")
</pallas_src>

<mosaic_0001>
module attributes {stable_mosaic.version = 11 : i64} {
  func.func @_self_attention_kernel(%arg0: i32, %arg1: memref<2x8x32xf32, #tpu.memory_space<vmem>>, %arg2: memref<32x384xf32, #tpu.memory_space<vmem>>, %arg3: memref<1x384xf32, #tpu.memory_space<vmem>>, %arg4: memref<2x8x32xf32, #tpu.memory_space<vmem>>) attributes {dimension_semantics = [#tpu.dimension_semantics<parallel>], iteration_bounds = array<i64: 1>, scalar_prefetch = 0 : i64, scratch_operands = 0 : i64, tpu.core_type = #tpu.core_type<tc>, window_params = [{transform_indices = @transform_0, window_bounds = array<i64: 2, 8, 32>}, {pipeline_mode = #tpu.pipeline_mode<synchronous>, transform_indices = @transform_1, window_bounds = array<i64: 32, 384>}, {pipeline_mode = #tpu.pipeline_mode<synchronous>, transform_indices = @transform_2, window_bounds = array<i64: 1, 384>}, {transform_indices = @transform_3, window_bounds = array<i64: 2, 8, 32>}]} {
    %c0 = arith.constant 0 : index
    %c0_0 = arith.constant 0 : index
    %c0_1 = arith.constant 0 : index
    %0 = vector.load %arg1[%c0, %c0_0, %c0_1] : memref<2x8x32xf32, #tpu.memory_space<vmem>>, vector<2x8x32xf32>
    %1 = vector.shape_cast %0 : vector<2x8x32xf32> to vector<16x32xf32>
    %c0_2 = arith.constant 0 : index
    %c0_3 = arith.constant 0 : index
    %2 = vector.load %arg2[%c0_2, %c0_3] : memref<32x384xf32, #tpu.memory_space<vmem>>, vector<32x384xf32>
    %cst = arith.constant dense<0.000000e+00> : vector<16x384xf32>
    %3 = tpu.matmul %1, %2, %cst {dimension_numbers = #tpu.dot_dimension_numbers<[1], [0], [0], [1], [0, 0, 1, 1], [], []>} : vector<16x32xf32>, vector<32x384xf32>, vector<16x384xf32> -> vector<16x384xf32>
    %c0_4 = arith.constant 0 : index
    %c0_5 = arith.constant 0 : index
    %4 = vector.load %arg3[%c0_4, %c0_5] : memref<1x384xf32, #tpu.memory_space<vmem>>, vector<1x384xf32>
    %5 = vector.broadcast %4 : vector<1x384xf32> to vector<16x384xf32>
    %6 = arith.addf %3, %5 : vector<16x384xf32>
    %7 = vector.shape_cast %6 : vector<16x384xf32> to vector<2x8x384xf32>
    %8 = vector.extract_strided_slice %7 {offsets = [0, 0, 0], sizes = [2, 8, 128], strides = [1, 1, 1]} : vector<2x8x384xf32> to vector<2x8x128xf32>
    %9 = vector.extract_strided_slice %7 {offsets = [0, 0, 128], sizes = [2, 8, 128], strides = [1, 1, 1]} : vector<2x8x384xf32> to vector<2x8x128xf32>
    %10 = vector.extract_strided_slice %7 {offsets = [0, 0, 256], sizes = [2, 8, 128], strides = [1, 1, 1]} : vector<2x8x384xf32> to vector<2x8x128xf32>
    "tpu.trace_start"() <{level = 10 : i32, message = "bsd,btd->bst"}> : () -> ()
    %cst_6 = arith.constant dense<0.000000e+00> : vector<2x8x8xf32>
    %11 = tpu.matmul %8, %9, %cst_6 {dimension_numbers = #tpu.dot_dimension_numbers<[2], [2], [1], [1], [0, 0, 0, 1, 1, 1], [0], [0]>} : vector<2x8x128xf32>, vector<2x8x128xf32>, vector<2x8x8xf32> -> vector<2x8x8xf32>
    "tpu.trace_stop"() : () -> ()
    %cst_7 = arith.constant dense<0xFF800000> : vector<2x8xf32>
    %12 = vector.multi_reduction <maximumf>, %11, %cst_7 [2] : vector<2x8x8xf32> to vector<2x8xf32>
    %13 = vector.shape_cast %12 : vector<2x8xf32> to vector<2x8x1xf32>
    %14 = vector.broadcast %13 : vector<2x8x1xf32> to vector<2x8x8xf32>
    %15 = arith.subf %11, %14 : vector<2x8x8xf32>
    %16 = math.exp %15 : vector<2x8x8xf32>
    %cst_8 = arith.constant dense<0.000000e+00> : vector<2x8xf32>
    %17 = vector.multi_reduction <add>, %16, %cst_8 [2] : vector<2x8x8xf32> to vector<2x8xf32>
    %18 = vector.shape_cast %17 : vector<2x8xf32> to vector<2x8x1xf32>
    %19 = vector.broadcast %18 : vector<2x8x1xf32> to vector<2x8x8xf32>
    %20 = arith.divf %16, %19 : vector<2x8x8xf32>
    "tpu.trace_start"() <{level = 10 : i32, message = "bst,btd->bsd"}> : () -> ()
    %cst_9 = arith.constant dense<0.000000e+00> : vector<2x8x128xf32>
    %21 = tpu.matmul %20, %10, %cst_9 {dimension_numbers = #tpu.dot_dimension_numbers<[2], [1], [1], [2], [0, 0, 0, 1, 1, 2], [0], [0]>} : vector<2x8x8xf32>, vector<2x8x128xf32>, vector<2x8x128xf32> -> vector<2x8x128xf32>
    "tpu.trace_stop"() : () -> ()
    %22 = vector.extract_strided_slice %21 {offsets = [0, 0, 0], sizes = [2, 8, 32], strides = [1, 1, 1]} : vector<2x8x128xf32> to vector<2x8x32xf32>
    %c0_10 = arith.constant 0 : index
    %c0_11 = arith.constant 0 : index
    %c0_12 = arith.constant 0 : index
    %23 = vector.load %arg4[%c0_10, %c0_11, %c0_12] : memref<2x8x32xf32, #tpu.memory_space<vmem>>, vector<2x8x32xf32>
    tpu.vector_store %arg4[%c0_10, %c0_11, %c0_12], %22 {strides = array<i32>} : memref<2x8x32xf32, #tpu.memory_space<vmem>>, vector<2x8x32xf32>,
    return
  }
  func.func @transform_0(%arg0: i32) -> (i32, i32, i32) {
    %c0_i32 = arith.constant 0 : i32
    %c0_i32_0 = arith.constant 0 : i32
    %c0_i32_1 = arith.constant 0 : i32
    return %arg0, %c0_i32, %c0_i32_0 : i32, i32, i32
  }
  func.func @transform_1(%arg0: i32) -> (i32, i32) {
    %c0_i32 = arith.constant 0 : i32
    %c0_i32_0 = arith.constant 0 : i32
    %c0_i32_1 = arith.constant 0 : i32
    return %c0_i32, %c0_i32_0 : i32, i32
  }
  func.func @transform_2(%arg0: i32) -> (i32, i32) {
    %c0_i32 = arith.constant 0 : i32
    %c0_i32_0 = arith.constant 0 : i32
    %c0_i32_1 = arith.constant 0 : i32
    return %c0_i32, %c0_i32_0 : i32, i32
  }
  func.func @transform_3(%arg0: i32) -> (i32, i32, i32) {
    %c0_i32 = arith.constant 0 : i32
    %c0_i32_0 = arith.constant 0 : i32
    %c0_i32_1 = arith.constant 0 : i32
    return %arg0, %c0_i32, %c0_i32_0 : i32, i32, i32
  }
}

</mosaic_0001>

<bundles_post_ra>
// kernel: tpu_custom_call.1
= control target key start
LH: loop header
LB: loop body
LE: loop exit
PB: predicated region body
PF: predicated region fallthrough
CT: control target
= control target key end

     0   :  { %8 = vsyncpa [#allocation3], 0  ;;  %s818_s0 = inlined_call_operand.hbm [shape: f32[2,8,32], index: 0, kind: input, shape index: {}]   ;;  %s819_s1 = inlined_call_operand.hbm [shape: f32[32,384], index: 1, kind: input, shape index: {}]   ;;  %s820_s2 = inlined_call_operand.vmem [shape: f32[1,384], index: 2, kind: input, shape index: {}]   ;;  %s821_s3 = inlined_call_operand.hbm [shape: f32[2,8,32], index: 3, kind: output, shape index: {}]  }
   0x1   :  { %9 = vsyncpa [#allocation6], 0 }
   0x2   :  { %10 = vsyncpa [#allocation4], 0  ;;  %s718_s12 = smov [#allocation2]   ;;  %s646_s16 = scalar_lea.hbm %s818_s0, 256 }
   0x3   :  { %s16_s13 = sshll.u32 %s718_s12, 4  ;;  %p647_p0 = scmp.ne.s32.totalorder %s818_s0, %s646_s16  ;;  %s17_s13 = int_to_ptr.vmem [resolvable:$true] %s16_s13 }
   0x4   :  { %p650_p1 = scmp.lt.u32.totalorder %s646_s16, %s818_s0 }
   0x6   :  { %p652_p2 = pnand %p650_p1, %p647_p0 }
   0x8   :  { %655 = shalt.err (!%p652_p2)
}
   0x9   :  { %s656_s21 = scalar_lea.vmem %s17_s13, 256  ;;  %p661_p4 = scmp.lt.s32.totalorder %s17_s13, %s17_s13 }
   0xa   :  { %p657_p3 = scmp.ne.s32.totalorder %s17_s13, %s656_s21  ;;  %p662_p5 = scmp.lt.s32.totalorder %s656_s21, %s656_s21 }
   0xc   :  { %p663_p6 = por %p662_p5, %p661_p4 }
   0xe   :  { %p664_p7 = pnand %p663_p6, %p657_p3 }
  0x10   :  { %667 = shalt.err (!%p664_p7)
}
  0x11   :  { %s719_s22 = smov 128   ;;  %s720_s23 = smov 8  }
  0x12   :  { %22 = dma.hbm_to_vmem [thread:$0]  %s818_s0, 256, %s17_s13, [#allocation3], %s719_s22, %s719_s22, %s720_s23  }
  0x13   :  { %s721_s26 = smov [#allocation5]   ;;  %s668_s30 = scalar_lea.hbm %s819_s1, 1536 }
  0x14   :  { %s28_s27 = sshll.u32 %s721_s26, 4  ;;  %p669_p8 = scmp.ne.s32.totalorder %s819_s1, %s668_s30  ;;  %s29_s27 = int_to_ptr.vmem [resolvable:$true] %s28_s27 }
  0x15   :  { %p672_p9 = scmp.lt.u32.totalorder %s668_s30, %s819_s1 }
  0x17   :  { %p674_p10 = pnand %p672_p9, %p669_p8 }
  0x19   :  { %677 = shalt.err (!%p674_p10)
}
  0x1a   :  { %s678_s8 = scalar_lea.vmem %s29_s27, 1536  ;;  %p683_p12 = scmp.lt.s32.totalorder %s29_s27, %s29_s27 }
  0x1b   :  { %p679_p11 = scmp.ne.s32.totalorder %s29_s27, %s678_s8  ;;  %p684_p13 = scmp.lt.s32.totalorder %s678_s8, %s678_s8 }
  0x1d   :  { %p685_p0 = por %p684_p13, %p683_p12 }
  0x1f   :  { %p686_p1 = pnand %p685_p0, %p679_p11 }
  0x21   :  { %689 = shalt.err (!%p686_p1)
}
  0x22   :  { %s722_s0 = smov 384   ;;  %s723_s9 = smov 24  }
  0x23   :  { %34 = dma.hbm_to_vmem [thread:$0]  %s819_s1, 1536, %s29_s27, [#allocation6], %s722_s0, %s722_s0, %s723_s9  }
  0x24   :  { %712 = dma.done.wait [#allocation3], 256  }
  0x25   :  { %713 = vsyncadd [#allocation3], 4294967040 }
  0x26   :  { %714 = dma.done.wait [#allocation6], 1536  }
  0x27   :  { %715 = vsyncadd [#allocation6], 4294965760  ;;  %v724_v0 = vmov 0.0   ;;  %v46_v1 = vld [vmem:[#allocation5 + $0x8] sm:$0xff]  ;;  %v49_v2 = vld [vmem:[#allocation5 + $0x20] sm:$0xff]  ;;  %vm74_vm0 = vcmask 261120   ;;  %v59_v21 = vlaneseq }
  0x28   :  { %145 = vmatprep.mubr.f32.mxu0 %v724_v0  ;;  %v45_v3 = vld [vmem:[#allocation5] sm:$0xff]  ;;  %v613_v4 = vpack.c.bf16 %v49_v2, %v46_v1  ;;  %v48_v5 = vld [vmem:[#allocation5 + $0x18] sm:$0xff]  ;;  %v55_v7 = vld [vmem:[#allocation5 + $0x50] sm:$0xff]  ;;  %vm725_vm1 = vmmov 0   ;;  %vm373_vm2 = vcmask 64512  }
  0x29   :  { %v52_v6 = vld [vmem:[#allocation5 + $0x38] sm:$0xff]  ;;  %v615_v8 = vpack.c.bf16 %v48_v5, %v45_v3  ;;  %v51_v10 = vld [vmem:[#allocation5 + $0x30] sm:$0xff]  ;;  %v54_v11 = vld [vmem:[#allocation5 + $0x48] sm:$0xff]  ;;  %v60_v22 = vshrl.u32 %v59_v21, 7 }
  0x2a   :  { %v617_v9 = vpack.c.bf16 %v55_v7, %v52_v6  ;;  %v43_v12 = vld [vmem:[#allocation2] sm:$0xff]  ;;  %614 = vmatprep.subr.bf16.mxu0 %v613_v4  ;;  %v50_v14 = vld [vmem:[#allocation5 + $0x28] sm:$0xff]  ;;  %v619_v15 = vpack.c.bf16 %v54_v11, %v51_v10  ;;  %v53_v17 = vld [vmem:[#allocation5 + $0x40] sm:$0xff] }
  0x2b   :  { %v47_v13 = vld [vmem:[#allocation5 + $0x10] sm:$0xff]  ;;  %590 = vmatprep.mubr.msk.f32.mxu1 %vm74_vm0, %v43_v12  ;;  %616 = vmatpush1.bf16.msra.mxu0 %v615_v8  ;;  %v56_v18 = vld [vmem:[#allocation5 + $0x58] sm:$0xff]  ;;  %v65_v23 = vsub.s32 1, %v60_v22  ;;  %v61_v25 = vsub.s32 0, %v60_v22  ;;  %v69_v26 = vsub.s32 2, %v60_v22 }
  0x2c   :  { %v621_v16 = vpack.c.bf16 %v50_v14, %v47_v13  ;;  %618 = vmatprep.subr.bf16.mxu0 %v617_v9  ;;  %v625_v19 = vpack.c.bf16 %v56_v18, %v53_v17  ;;  %v44_v20 = vld [vmem:[#allocation2 + $0x8] sm:$0xff]  ;;  %v57_v24 = vld [vmem:[%s820_s2] sm:$0x7]  ;;  %s726_s2 = smov [#allocation7]  }
  0x2d   :  { %v66_v27 = vrot.slane %v57_v24, %v65_v23  ;;  %v62_v29 = vrot.slane %v57_v24, %v61_v25  ;;  %v70_v31 = vrot.slane %v57_v24, %v69_v26  ;;  %s549_s13 = sshll.u32 %s726_s2, 4  ;;  %s550_s13 = int_to_ptr.vmem [resolvable:$true] %s549_s13 }
  0x2e   :  { %622 = vmatprep.subr.bf16.mxu1 %v621_v16  ;;  %s690_s14 = scalar_lea.vmem %s550_s13, 256  ;;  %p695_p3 = scmp.lt.s32.totalorder %s550_s13, %s550_s13 }
  0x2f   :  { %624 = vmatpush3.bf16.msra.mxu1 %v621_v16  ;;  %620 = vmatpush1.bf16.msra.mxu0 %v619_v15  ;;  %p691_p2 = scmp.ne.s32.totalorder %s550_s13, %s690_s14  ;;  %p696_p4 = scmp.lt.s32.totalorder %s690_s14, %s690_s14 }
  0x30   :  { %626 = vmatprep.subr.bf16.mxu1 %v625_v19  ;;  %598 = vmatprep.subr.mxu0 %v724_v0 }
  0x31   :  { %p697_p5 = por %p696_p4, %p695_p3 }
  0x32   :  { %562 = vmatmul.mubr.msk.f32.vlgmr.msra.gmra.mrb[0].mxu0 %vm74_vm0, %v43_v12 }
  0x33   :  { %628 = vmatpush3.bf16.msra.mxu1 %v625_v19  ;;  %151 = vmatprep.mubr.f32.mxu0 %v724_v0  ;;  %p698_p6 = pnand %p697_p5, %p691_p2 }
  0x34   :  { %593 = vmatprep.subr.mxu1 %v724_v0 }
  0x36   :  { %591 = vmatmul.mubr.msk.f32.vlgmr.msra.gmra.mrb[0].mxu1 %vm74_vm0, %v44_v20  ;;  %563 = vmatmul.mubr.msk.f32.gmra.mrb[2].mxu0 %vm74_vm0, %v44_v20 }
  0x37   :  { %595 = vmatprep.mubr.msk.f32.mxu1 %vm725_vm1, %v724_v0  ;;  %600 = vmatprep.mubr.msk.f32.mxu0 %vm725_vm1, %v724_v0 }
 0x105   :  { %v147_v28 = vpop.f32.mrb[0].mxu0 }
 0x106   :  { %v149_v30 = vpop.f32.mrb[1].mxu0  ;;  %v148_v36 = vadd.f32 %v147_v28, %v62_v29 }
 0x107   :  { %v150_v32 = vadd.f32 %v149_v30, %v66_v27 }
 0x109   :  { %v592_v33 = vpop.f32.mrb[0].mxu1  ;;  %v153_v34 = vpop.f32.mrb[2].mxu0  ;;  %594 = vmatpush3.xpose.msra.mxu1 %v150_v32 }
 0x10a   :  { %v224_v35 = vpop.f32.mrb[1].mxu1  ;;  %v155_v37 = vpop.f32.mrb[3].mxu0  ;;  %603 = vmatprep.subr.mxu1 %v724_v0  ;;  %v230_v40 = vadd.f32 %v592_v33, %v70_v31  ;;  %v154_v41 = vadd.f32 %v153_v34, %v62_v29 }
 0x10b   :  { %v225_v38 = vadd.f32 %v224_v35, %v70_v31  ;;  %v156_v39 = vadd.f32 %v155_v37, %v66_v27 }
 0x10c   :  { %596 = vmatmul.mubr.f32.vlgmr.msra.gmra.mrb[2].mxu1 %v148_v36 }
 0x10d   :  { %599 = vmatpush3.xpose.msra.mxu0 %v156_v39  ;;  %604 = vmatpush3.msra.mxu1 %v225_v38 }
 0x10e   :  { %608 = vmatprep.subr.mxu0 %v724_v0  ;;  %605 = vmatprep.mubr.msk.f32.mxu1 %vm725_vm1, %v724_v0 }
 0x110   :  { %601 = vmatmul.mubr.f32.vlgmr.msra.gmra.mrb[4].mxu0 %v154_v41 }
 0x111   :  { %609 = vmatpush3.msra.mxu0 %v230_v40  ;;  %610 = vmatprep.mubr.msk.f32.mxu0 %vm725_vm1, %v724_v0 }
 0x1df   :  { %v299_v42 = vpop.f32.mrb[2].mxu1 }
 0x1e0   :  { %v597_v43 = vpop.f32.mrb[3].mxu1  ;;  %v374_v44 = vsel %vm373_vm2, %v299_v42, -inf }
 0x1e1   :  { %375 = vmax.xlane.f32.xlu0 %v374_v44 }
 0x1e3   :  { %v369_v45 = vpop.f32.mrb[4].mxu0 }
 0x1e4   :  { %v602_v46 = vpop.f32.mrb[5].mxu0  ;;  %v377_v47 = vsel %vm373_vm2, %v369_v45, -inf }
 0x1e5   :  { %378 = vmax.xlane.f32.xlu0 %v377_v47 }
 0x26e   :  { %v376_v48 = vpop.xlane.xlu0 %375 }
 0x26f   :  { %v380_v49 = vsub.f32 %v299_v42, %v376_v48 }
 0x271   :  { %v382_v50 = vmul.f32 1.442695, %v380_v49 }
 0x272   :  { %v379_v51 = vpop.xlane.xlu0 %378 }
 0x273   :  { %638 = vpow2.f32 %v382_v50  ;;  %v381_v52 = vsub.f32 %v369_v45, %v379_v51 }
 0x275   :  { %v384_v53 = vmul.f32 1.442695, %v381_v52 }
 0x277   :  { %640 = vpow2.f32 %v384_v53 }
 0x27d   :  { %v639_v54 = vpop.eup %638 }
 0x27e   :  { %v386_v55 = vsel %vm373_vm2, %v639_v54, 0.0 }
 0x27f   :  { %387 = vadd.xlane.f32.xlu1 %v386_v55 }
 0x281   :  { %v641_v56 = vpop.eup %640 }
 0x282   :  { %v389_v57 = vsel %vm373_vm2, %v641_v56, 0.0 }
 0x283   :  { %390 = vadd.xlane.f32.xlu1 %v389_v57 }
 0x30c   :  { %v388_v58 = vpop.xlane.xlu1 %387 }
 0x30d   :  { %642 = vrcp.f32 %v388_v58 }
 0x310   :  { %v391_v59 = vpop.xlane.xlu1 %390 }
 0x311   :  { %644 = vrcp.f32 %v391_v59 }
 0x317   :  { %v643_v60 = vpop.eup %642 }
 0x318   :  { %v393_v61 = vmul.f32 %v643_v60, %v639_v54 }
 0x31a   :  { %606 = vmatmul.mubr.msk.f32.vlgmr.msra.gmra.mrb[4].mxu1 %vm373_vm2, %v393_v61 }
 0x31b   :  { %v645_v62 = vpop.eup %644 }
 0x31c   :  { %v395_v63 = vmul.f32 %v645_v62, %v641_v56 }
 0x31e   :  { %611 = vmatmul.mubr.msk.f32.vlgmr.msra.gmra.mrb[6].mxu0 %vm373_vm2, %v395_v63 }
 0x3ed   :  { %v465_v0 = vpop.f32.mrb[4].mxu1 }
 0x3ee   :  { %542 = vst.msk [vmem:[#allocation7] sm:$0xff] %vm74_vm0, %v465_v0  ;;  %v607_v1 = vpop.f32.mrb[5].mxu1 }
 0x3f1   :  { %v538_v2 = vpop.f32.mrb[6].mxu0 }
 0x3f2   :  { %543 = vst.msk [vmem:[#allocation7 + $0x8] sm:$0xff] %vm74_vm0, %v538_v2  ;;  %v612_v3 = vpop.f32.mrb[7].mxu0 }
 0x3f3   :  { %701 = shalt.err (!%p698_p6)
}
 0x3f4   :  { %s702_s17 = scalar_lea.hbm %s821_s3, 256 }
 0x3f5   :  { %p703_p7 = scmp.ne.s32.totalorder %s821_s3, %s702_s17  ;;  %p706_p8 = scmp.lt.u32.totalorder %s702_s17, %s821_s3 }
 0x3f7   :  { %p708_p9 = pnand %p706_p8, %p703_p7 }
 0x3f9   :  { %711 = shalt.err (!%p708_p9)
}
 0x3fa   :  { %555 = dma.vmem_to_hbm [thread:$0]  %s550_s13, 256, %s821_s3, [#allocation4], %s719_s22, %s719_s22, %s720_s23  }
 0x3fb   :  { %716 = dma.done.wait [#allocation4], 256  }
 0x3fc   :  { %717 = vsyncadd [#allocation4], 4294967040 }
 0x3fd   :  { %559 = vsyncpa [#allocation3], 1 }
 0x3fe   :  { %560 = vsyncpa [#allocation6], 1 }
 0x3ff   :  { %561 = vsyncpa [#allocation4], 1 }

</bundles_post_ra>
